<compile_context>
chip_gen: v5e
topology: v5e:2x2
jax: 0.10.0
libtpu: 0.0.40
codegen_flags: <defaults>
</compile_context>

<pallas_src>
from functools import partial

import jax
import jax.numpy as jnp
from jax.experimental import pallas as pl
from jax.experimental.pallas import tpu as pltpu

HIDDEN = 20          # fixed by the nn.Module
LEAKY_SLOPE = 0.01   # PyTorch nn.LeakyReLU() default
BATCH_TILE = 512     # lanes (batch elements) per grid step; multiple of 128


def _round_up(x, m):
    return ((x + m - 1) // m) * m


def _leaky_relu(x):
    return jnp.where(x >= 0, x, LEAKY_SLOPE * x)


def unstructured_kernel(dts_ref,   # SMEM (nlayers,)                 self.dts
                        x_ref,     # VMEM (S, TB)    input tile, transposed
                        w_ref,     # VMEM (2*nlayers+2, S, S)  packed weights
                        b_ref,     # VMEM (2*nlayers+2, S, 1)  packed biases
                        out_ref,   # VMEM (out_dim, TB)
                        *, nlayers, out_dim):
    # lift (slot 0):  x <- W_lift @ x_in + b_lift    (zero-padded rows stay 0)
    x = jnp.dot(w_ref[0], x_ref[...], preferred_element_type=jnp.float32) + b_ref[0]

    # residual blocks: x <- x + dts[i] * LeakyReLU(W2 @ LeakyReLU(W1 @ x + b1) + b2)
    # nlayers is static & small -> unrolled.  (Switch to lax.fori_loop with
    # dynamic w_ref[i] indexing if nlayers ever grows beyond ~8-16.)
    for i in range(nlayers):
        h = _leaky_relu(
            jnp.dot(w_ref[1 + i], x, preferred_element_type=jnp.float32)
            + b_ref[1 + i])
        h = _leaky_relu(
            jnp.dot(w_ref[1 + nlayers + i], h, preferred_element_type=jnp.float32)
            + b_ref[1 + nlayers + i])
        x = x + dts_ref[i] * h

    # proj (slot 2*nlayers+1): padded rows [out_dim:] of the slot are zero.
    y = (jnp.dot(w_ref[1 + 2 * nlayers], x, preferred_element_type=jnp.float32)
         + b_ref[1 + 2 * nlayers])
    out_ref[...] = y[:out_dim, :].astype(out_ref.dtype)


def pack_params(params, in_dim, out_dim, nlayers):
    """Pack PyTorch-layout parameters into (dts, w_slab, b_slab)."""
    dts, lw, lb, w1, b1, w2, b2, pw, pb = params
    dtype = lw.dtype
    S = _round_up(max(HIDDEN, in_dim, out_dim), 8)   # sublane-aligned feature pad
    n_slots = 2 * nlayers + 2
    w_slab = jnp.zeros((n_slots, S, S), dtype)
    b_slab = jnp.zeros((n_slots, S, 1), dtype)
    # slot 0: lift
    w_slab = w_slab.at[0, :HIDDEN, :in_dim].set(lw)
    b_slab = b_slab.at[0, :HIDDEN, 0].set(lb)
    # slots 1..nlayers: linears[i]
    w_slab = w_slab.at[1:1 + nlayers, :HIDDEN, :HIDDEN].set(w1)
    b_slab = b_slab.at[1:1 + nlayers, :HIDDEN, 0].set(b1)
    # slots nlayers+1..2*nlayers: linearsB[i]
    w_slab = w_slab.at[1 + nlayers:1 + 2 * nlayers, :HIDDEN, :HIDDEN].set(w2)
    b_slab = b_slab.at[1 + nlayers:1 + 2 * nlayers, :HIDDEN, 0].set(b2)
    # slot 2*nlayers+1: proj
    w_slab = w_slab.at[1 + 2 * nlayers, :out_dim, :HIDDEN].set(pw)
    b_slab = b_slab.at[1 + 2 * nlayers, :out_dim, 0].set(pb)
    return dts, w_slab, b_slab


def unstructured_forward(x, packed, *, nlayers, out_dim, batch_tile=BATCH_TILE):
    dts, w_slab, b_slab = packed
    B, in_dim = x.shape
    n_slots, S, _ = w_slab.shape

    # Batch lives on the lane axis; pad it to a multiple of the lane tile.
    TB = min(batch_tile, _round_up(B, 128))
    B_pad = _round_up(B, TB)
    x_t = jnp.zeros((S, B_pad), x.dtype).at[:in_dim, :B].set(x.T)

    out_t = pl.pallas_call(
        partial(unstructured_kernel, nlayers=nlayers, out_dim=out_dim),
        out_shape=jax.ShapeDtypeStruct((out_dim, B_pad), x.dtype),
        grid=(B_pad // TB,),
        in_specs=[
            pl.BlockSpec(memory_space=pltpu.MemorySpace.SMEM),       # dts scalars
            pl.BlockSpec((S, TB), lambda i: (0, i)),                 # x batch tile
            pl.BlockSpec((n_slots, S, S), lambda i: (0, 0, 0)),      # weights, VMEM-resident
            pl.BlockSpec((n_slots, S, 1), lambda i: (0, 0, 0)),      # biases, VMEM-resident
        ],
        out_specs=pl.BlockSpec((out_dim, TB), lambda i: (0, i)),     # lane-dense output
        compiler_params=pltpu.CompilerParams(
            dimension_semantics=("parallel",)),                      # 2 TCs on v7x
    )(dts, x_t, w_slab, b_slab)

    return out_t[:, :B].T


def init_params(key, in_dim, out_dim, nlayers, dtype=jnp.float32):
    """Deterministic synthetic parameters in PyTorch layout (weight = (out, in))."""
    ks = jax.random.split(key, 10)
    scale = 0.1
    dts = jax.random.normal(ks[0], (nlayers,), dtype)                        # self.dts
    lw = scale * jax.random.normal(ks[1], (HIDDEN, in_dim), dtype)           # lift.weight
    lb = scale * jax.random.normal(ks[2], (HIDDEN,), dtype)                  # lift.bias
    w1 = scale * jax.random.normal(ks[3], (nlayers, HIDDEN, HIDDEN), dtype)  # linears[i].weight
    b1 = scale * jax.random.normal(ks[4], (nlayers, HIDDEN), dtype)
    w2 = scale * jax.random.normal(ks[5], (nlayers, HIDDEN, HIDDEN), dtype)  # linearsB[i].weight
    b2 = scale * jax.random.normal(ks[6], (nlayers, HIDDEN), dtype)
    pw = scale * jax.random.normal(ks[7], (out_dim, HIDDEN), dtype)          # proj.weight
    pb = scale * jax.random.normal(ks[8], (out_dim,), dtype)
    return (dts, lw, lb, w1, b1, w2, b2, pw, pb)


def reference_forward(x, params, *, nlayers):
    """Pure-JAX reference matching the PyTorch forward (PyTorch weight layout)."""
    dts, lw, lb, w1, b1, w2, b2, pw, pb = params
    x = x @ lw.T + lb
    for i in range(nlayers):
        h = _leaky_relu(x @ w1[i].T + b1[i])
        h = _leaky_relu(h @ w2[i].T + b2[i])
        x = x + dts[i] * h
    return x @ pw.T + pb


if __name__ == "__main__":
    key = jax.random.PRNGKey(0)
    in_dim, out_dim, nlayers = 4, 3, 3
    batch = 8

    kx, kp = jax.random.split(key)
    x = jax.random.normal(kx, (batch, in_dim), jnp.float32)
    params = init_params(kp, in_dim, out_dim, nlayers)
    packed = pack_params(params, in_dim, out_dim, nlayers)

    out = unstructured_forward(x, packed, nlayers=nlayers, out_dim=out_dim)
    out = jax.block_until_ready(out)

    ref = reference_forward(x, params, nlayers=nlayers)
    assert out.shape == (batch, out_dim)
    assert jnp.allclose(out, ref, atol=1e-5, rtol=1e-5), "mismatch vs reference"

    print("KERNEL_OK")
</pallas_src>

<mosaic_0001>
module attributes {stable_mosaic.version = 11 : i64} {
  func.func @unstructured_kernel(%arg0: i32, %arg1: memref<3xf32, #tpu.memory_space<smem>>, %arg2: memref<24x128xf32, #tpu.memory_space<vmem>>, %arg3: memref<8x24x24xf32, #tpu.memory_space<vmem>>, %arg4: memref<8x24x1xf32, #tpu.memory_space<vmem>>, %arg5: memref<3x128xf32, #tpu.memory_space<vmem>>) attributes {dimension_semantics = [#tpu.dimension_semantics<parallel>], iteration_bounds = array<i64: 1>, scalar_prefetch = 0 : i64, scratch_operands = 0 : i64, tpu.core_type = #tpu.core_type<tc>, window_params = [{transform_indices = @transform_0, window_bounds = array<i64: 3>}, {transform_indices = @transform_1, window_bounds = array<i64: 24, 128>}, {pipeline_mode = #tpu.pipeline_mode<synchronous>, transform_indices = @transform_2, window_bounds = array<i64: 8, 24, 24>}, {pipeline_mode = #tpu.pipeline_mode<synchronous>, transform_indices = @transform_3, window_bounds = array<i64: 8, 24, 1>}, {transform_indices = @transform_4, window_bounds = array<i64: 3, 128>}]} {
    %c0 = arith.constant 0 : index
    %c0_0 = arith.constant 0 : index
    %c0_1 = arith.constant 0 : index
    %0 = vector.load %arg3[%c0, %c0_0, %c0_1] : memref<8x24x24xf32, #tpu.memory_space<vmem>>, vector<1x24x24xf32>
    %1 = vector.shape_cast %0 : vector<1x24x24xf32> to vector<24x24xf32>
    %c0_2 = arith.constant 0 : index
    %c0_3 = arith.constant 0 : index
    %2 = vector.load %arg2[%c0_2, %c0_3] : memref<24x128xf32, #tpu.memory_space<vmem>>, vector<24x128xf32>
    %cst = arith.constant dense<0.000000e+00> : vector<24x128xf32>
    %3 = tpu.matmul %1, %2, %cst {dimension_numbers = #tpu.dot_dimension_numbers<[1], [0], [0], [1], [0, 0, 1, 1], [], []>} : vector<24x24xf32>, vector<24x128xf32>, vector<24x128xf32> -> vector<24x128xf32>
    %c0_4 = arith.constant 0 : index
    %c0_5 = arith.constant 0 : index
    %c0_6 = arith.constant 0 : index
    %4 = vector.load %arg4[%c0_4, %c0_5, %c0_6] : memref<8x24x1xf32, #tpu.memory_space<vmem>>, vector<1x24x1xf32>
    %5 = vector.shape_cast %4 : vector<1x24x1xf32> to vector<24x1xf32>
    %6 = vector.broadcast %5 : vector<24x1xf32> to vector<24x128xf32>
    %7 = arith.addf %3, %6 : vector<24x128xf32>
    %c1 = arith.constant 1 : index
    %c0_7 = arith.constant 0 : index
    %c0_8 = arith.constant 0 : index
    %8 = vector.load %arg3[%c1, %c0_7, %c0_8] : memref<8x24x24xf32, #tpu.memory_space<vmem>>, vector<1x24x24xf32>
    %9 = vector.shape_cast %8 : vector<1x24x24xf32> to vector<24x24xf32>
    %cst_9 = arith.constant dense<0.000000e+00> : vector<24x128xf32>
    %10 = tpu.matmul %9, %7, %cst_9 {dimension_numbers = #tpu.dot_dimension_numbers<[1], [0], [0], [1], [0, 0, 1, 1], [], []>} : vector<24x24xf32>, vector<24x128xf32>, vector<24x128xf32> -> vector<24x128xf32>
    %c1_10 = arith.constant 1 : index
    %c0_11 = arith.constant 0 : index
    %c0_12 = arith.constant 0 : index
    %11 = vector.load %arg4[%c1_10, %c0_11, %c0_12] : memref<8x24x1xf32, #tpu.memory_space<vmem>>, vector<1x24x1xf32>
    %12 = vector.shape_cast %11 : vector<1x24x1xf32> to vector<24x1xf32>
    %13 = vector.broadcast %12 : vector<24x1xf32> to vector<24x128xf32>
    %14 = arith.addf %10, %13 : vector<24x128xf32>
    %cst_13 = arith.constant 0.000000e+00 : f32
    %15 = vector.broadcast %cst_13 : f32 to vector<24x128xf32>
    %16 = arith.cmpf oge, %14, %15 : vector<24x128xf32>
    %cst_14 = arith.constant 0.00999999977 : f32
    %17 = vector.broadcast %cst_14 : f32 to vector<24x128xf32>
    %18 = arith.mulf %17, %14 : vector<24x128xf32>
    %19 = arith.select %16, %14, %18 : vector<24x128xi1>, vector<24x128xf32>
    %c4 = arith.constant 4 : index
    %c0_15 = arith.constant 0 : index
    %c0_16 = arith.constant 0 : index
    %20 = vector.load %arg3[%c4, %c0_15, %c0_16] : memref<8x24x24xf32, #tpu.memory_space<vmem>>, vector<1x24x24xf32>
    %21 = vector.shape_cast %20 : vector<1x24x24xf32> to vector<24x24xf32>
    %cst_17 = arith.constant dense<0.000000e+00> : vector<24x128xf32>
    %22 = tpu.matmul %21, %19, %cst_17 {dimension_numbers = #tpu.dot_dimension_numbers<[1], [0], [0], [1], [0, 0, 1, 1], [], []>} : vector<24x24xf32>, vector<24x128xf32>, vector<24x128xf32> -> vector<24x128xf32>
    %c4_18 = arith.constant 4 : index
    %c0_19 = arith.constant 0 : index
    %c0_20 = arith.constant 0 : index
    %23 = vector.load %arg4[%c4_18, %c0_19, %c0_20] : memref<8x24x1xf32, #tpu.memory_space<vmem>>, vector<1x24x1xf32>
    %24 = vector.shape_cast %23 : vector<1x24x1xf32> to vector<24x1xf32>
    %25 = vector.broadcast %24 : vector<24x1xf32> to vector<24x128xf32>
    %26 = arith.addf %22, %25 : vector<24x128xf32>
    %cst_21 = arith.constant 0.000000e+00 : f32
    %27 = vector.broadcast %cst_21 : f32 to vector<24x128xf32>
    %28 = arith.cmpf oge, %26, %27 : vector<24x128xf32>
    %cst_22 = arith.constant 0.00999999977 : f32
    %29 = vector.broadcast %cst_22 : f32 to vector<24x128xf32>
    %30 = arith.mulf %29, %26 : vector<24x128xf32>
    %31 = arith.select %28, %26, %30 : vector<24x128xi1>, vector<24x128xf32>
    %c0_23 = arith.constant 0 : index
    %32 = memref.load %arg1[%c0_23] : memref<3xf32, #tpu.memory_space<smem>>
    %33 = vector.broadcast %32 : f32 to vector<24x128xf32>
    %34 = arith.mulf %33, %31 : vector<24x128xf32>
    %35 = arith.addf %7, %34 : vector<24x128xf32>
    %c2 = arith.constant 2 : index
    %c0_24 = arith.constant 0 : index
    %c0_25 = arith.constant 0 : index
    %36 = vector.load %arg3[%c2, %c0_24, %c0_25] : memref<8x24x24xf32, #tpu.memory_space<vmem>>, vector<1x24x24xf32>
    %37 = vector.shape_cast %36 : vector<1x24x24xf32> to vector<24x24xf32>
    %cst_26 = arith.constant dense<0.000000e+00> : vector<24x128xf32>
    %38 = tpu.matmul %37, %35, %cst_26 {dimension_numbers = #tpu.dot_dimension_numbers<[1], [0], [0], [1], [0, 0, 1, 1], [], []>} : vector<24x24xf32>, vector<24x128xf32>, vector<24x128xf32> -> vector<24x128xf32>
    %c2_27 = arith.constant 2 : index
    %c0_28 = arith.constant 0 : index
    %c0_29 = arith.constant 0 : index
    %39 = vector.load %arg4[%c2_27, %c0_28, %c0_29] : memref<8x24x1xf32, #tpu.memory_space<vmem>>, vector<1x24x1xf32>
    %40 = vector.shape_cast %39 : vector<1x24x1xf32> to vector<24x1xf32>
    %41 = vector.broadcast %40 : vector<24x1xf32> to vector<24x128xf32>
    %42 = arith.addf %38, %41 : vector<24x128xf32>
    %cst_30 = arith.constant 0.000000e+00 : f32
    %43 = vector.broadcast %cst_30 : f32 to vector<24x128xf32>
    %44 = arith.cmpf oge, %42, %43 : vector<24x128xf32>
    %cst_31 = arith.constant 0.00999999977 : f32
    %45 = vector.broadcast %cst_31 : f32 to vector<24x128xf32>
    %46 = arith.mulf %45, %42 : vector<24x128xf32>
    %47 = arith.select %44, %42, %46 : vector<24x128xi1>, vector<24x128xf32>
    %c5 = arith.constant 5 : index
    %c0_32 = arith.constant 0 : index
    %c0_33 = arith.constant 0 : index
    %48 = vector.load %arg3[%c5, %c0_32, %c0_33] : memref<8x24x24xf32, #tpu.memory_space<vmem>>, vector<1x24x24xf32>
    %49 = vector.shape_cast %48 : vector<1x24x24xf32> to vector<24x24xf32>
    %cst_34 = arith.constant dense<0.000000e+00> : vector<24x128xf32>
    %50 = tpu.matmul %49, %47, %cst_34 {dimension_numbers = #tpu.dot_dimension_numbers<[1], [0], [0], [1], [0, 0, 1, 1], [], []>} : vector<24x24xf32>, vector<24x128xf32>, vector<24x128xf32> -> vector<24x128xf32>
    %c5_35 = arith.constant 5 : index
    %c0_36 = arith.constant 0 : index
    %c0_37 = arith.constant 0 : index
    %51 = vector.load %arg4[%c5_35, %c0_36, %c0_37] : memref<8x24x1xf32, #tpu.memory_space<vmem>>, vector<1x24x1xf32>
    %52 = vector.shape_cast %51 : vector<1x24x1xf32> to vector<24x1xf32>
    %53 = vector.broadcast %52 : vector<24x1xf32> to vector<24x128xf32>
    %54 = arith.addf %50, %53 : vector<24x128xf32>
    %cst_38 = arith.constant 0.000000e+00 : f32
    %55 = vector.broadcast %cst_38 : f32 to vector<24x128xf32>
    %56 = arith.cmpf oge, %54, %55 : vector<24x128xf32>
    %cst_39 = arith.constant 0.00999999977 : f32
    %57 = vector.broadcast %cst_39 : f32 to vector<24x128xf32>
    %58 = arith.mulf %57, %54 : vector<24x128xf32>
    %59 = arith.select %56, %54, %58 : vector<24x128xi1>, vector<24x128xf32>
    %c1_40 = arith.constant 1 : index
    %60 = memref.load %arg1[%c1_40] : memref<3xf32, #tpu.memory_space<smem>>
    %61 = vector.broadcast %60 : f32 to vector<24x128xf32>
    %62 = arith.mulf %61, %59 : vector<24x128xf32>
    %63 = arith.addf %35, %62 : vector<24x128xf32>
    %c3 = arith.constant 3 : index
    %c0_41 = arith.constant 0 : index
    %c0_42 = arith.constant 0 : index
    %64 = vector.load %arg3[%c3, %c0_41, %c0_42] : memref<8x24x24xf32, #tpu.memory_space<vmem>>, vector<1x24x24xf32>
    %65 = vector.shape_cast %64 : vector<1x24x24xf32> to vector<24x24xf32>
    %cst_43 = arith.constant dense<0.000000e+00> : vector<24x128xf32>
    %66 = tpu.matmul %65, %63, %cst_43 {dimension_numbers = #tpu.dot_dimension_numbers<[1], [0], [0], [1], [0, 0, 1, 1], [], []>} : vector<24x24xf32>, vector<24x128xf32>, vector<24x128xf32> -> vector<24x128xf32>
    %c3_44 = arith.constant 3 : index
    %c0_45 = arith.constant 0 : index
    %c0_46 = arith.constant 0 : index
    %67 = vector.load %arg4[%c3_44, %c0_45, %c0_46] : memref<8x24x1xf32, #tpu.memory_space<vmem>>, vector<1x24x1xf32>
    %68 = vector.shape_cast %67 : vector<1x24x1xf32> to vector<24x1xf32>
    %69 = vector.broadcast %68 : vector<24x1xf32> to vector<24x128xf32>
    %70 = arith.addf %66, %69 : vector<24x128xf32>
    %cst_47 = arith.constant 0.000000e+00 : f32
    %71 = vector.broadcast %cst_47 : f32 to vector<24x128xf32>
    %72 = arith.cmpf oge, %70, %71 : vector<24x128xf32>
    %cst_48 = arith.constant 0.00999999977 : f32
    %73 = vector.broadcast %cst_48 : f32 to vector<24x128xf32>
    %74 = arith.mulf %73, %70 : vector<24x128xf32>
    %75 = arith.select %72, %70, %74 : vector<24x128xi1>, vector<24x128xf32>
    %c6 = arith.constant 6 : index
    %c0_49 = arith.constant 0 : index
    %c0_50 = arith.constant 0 : index
    %76 = vector.load %arg3[%c6, %c0_49, %c0_50] : memref<8x24x24xf32, #tpu.memory_space<vmem>>, vector<1x24x24xf32>
    %77 = vector.shape_cast %76 : vector<1x24x24xf32> to vector<24x24xf32>
    %cst_51 = arith.constant dense<0.000000e+00> : vector<24x128xf32>
    %78 = tpu.matmul %77, %75, %cst_51 {dimension_numbers = #tpu.dot_dimension_numbers<[1], [0], [0], [1], [0, 0, 1, 1], [], []>} : vector<24x24xf32>, vector<24x128xf32>, vector<24x128xf32> -> vector<24x128xf32>
    %c6_52 = arith.constant 6 : index
    %c0_53 = arith.constant 0 : index
    %c0_54 = arith.constant 0 : index
    %79 = vector.load %arg4[%c6_52, %c0_53, %c0_54] : memref<8x24x1xf32, #tpu.memory_space<vmem>>, vector<1x24x1xf32>
    %80 = vector.shape_cast %79 : vector<1x24x1xf32> to vector<24x1xf32>
    %81 = vector.broadcast %80 : vector<24x1xf32> to vector<24x128xf32>
    %82 = arith.addf %78, %81 : vector<24x128xf32>
    %cst_55 = arith.constant 0.000000e+00 : f32
    %83 = vector.broadcast %cst_55 : f32 to vector<24x128xf32>
    %84 = arith.cmpf oge, %82, %83 : vector<24x128xf32>
    %cst_56 = arith.constant 0.00999999977 : f32
    %85 = vector.broadcast %cst_56 : f32 to vector<24x128xf32>
    %86 = arith.mulf %85, %82 : vector<24x128xf32>
    %87 = arith.select %84, %82, %86 : vector<24x128xi1>, vector<24x128xf32>
    %c2_57 = arith.constant 2 : index
    %88 = memref.load %arg1[%c2_57] : memref<3xf32, #tpu.memory_space<smem>>
    %89 = vector.broadcast %88 : f32 to vector<24x128xf32>
    %90 = arith.mulf %89, %87 : vector<24x128xf32>
    %91 = arith.addf %63, %90 : vector<24x128xf32>
    %c7 = arith.constant 7 : index
    %c0_58 = arith.constant 0 : index
    %c0_59 = arith.constant 0 : index
    %92 = vector.load %arg3[%c7, %c0_58, %c0_59] : memref<8x24x24xf32, #tpu.memory_space<vmem>>, vector<1x24x24xf32>
    %93 = vector.shape_cast %92 : vector<1x24x24xf32> to vector<24x24xf32>
    %cst_60 = arith.constant dense<0.000000e+00> : vector<24x128xf32>
    %94 = tpu.matmul %93, %91, %cst_60 {dimension_numbers = #tpu.dot_dimension_numbers<[1], [0], [0], [1], [0, 0, 1, 1], [], []>} : vector<24x24xf32>, vector<24x128xf32>, vector<24x128xf32> -> vector<24x128xf32>
    %c7_61 = arith.constant 7 : index
    %c0_62 = arith.constant 0 : index
    %c0_63 = arith.constant 0 : index
    %95 = vector.load %arg4[%c7_61, %c0_62, %c0_63] : memref<8x24x1xf32, #tpu.memory_space<vmem>>, vector<1x24x1xf32>
    %96 = vector.shape_cast %95 : vector<1x24x1xf32> to vector<24x1xf32>
    %97 = vector.broadcast %96 : vector<24x1xf32> to vector<24x128xf32>
    %98 = arith.addf %94, %97 : vector<24x128xf32>
    %99 = vector.extract_strided_slice %98 {offsets = [0, 0], sizes = [3, 128], strides = [1, 1]} : vector<24x128xf32> to vector<3x128xf32>
    %c0_64 = arith.constant 0 : index
    %c0_65 = arith.constant 0 : index
    %100 = vector.load %arg5[%c0_64, %c0_65] : memref<3x128xf32, #tpu.memory_space<vmem>>, vector<3x128xf32>
    tpu.vector_store %arg5[%c0_64, %c0_65], %99 {strides = array<i32>} : memref<3x128xf32, #tpu.memory_space<vmem>>, vector<3x128xf32>,
    return
  }
  func.func @transform_0(%arg0: i32) -> i32 {
    %c0_i32 = arith.constant 0 : i32
    %c0_i32_0 = arith.constant 0 : i32
    return %c0_i32 : i32
  }
  func.func @transform_1(%arg0: i32) -> (i32, i32) {
    %c0_i32 = arith.constant 0 : i32
    %c0_i32_0 = arith.constant 0 : i32
    return %c0_i32, %arg0 : i32, i32
  }
  func.func @transform_2(%arg0: i32) -> (i32, i32, i32) {
    %c0_i32 = arith.constant 0 : i32
    %c0_i32_0 = arith.constant 0 : i32
    %c0_i32_1 = arith.constant 0 : i32
    %c0_i32_2 = arith.constant 0 : i32
    return %c0_i32, %c0_i32_0, %c0_i32_1 : i32, i32, i32
  }
  func.func @transform_3(%arg0: i32) -> (i32, i32, i32) {
    %c0_i32 = arith.constant 0 : i32
    %c0_i32_0 = arith.constant 0 : i32
    %c0_i32_1 = arith.constant 0 : i32
    %c0_i32_2 = arith.constant 0 : i32
    return %c0_i32, %c0_i32_0, %c0_i32_1 : i32, i32, i32
  }
  func.func @transform_4(%arg0: i32) -> (i32, i32) {
    %c0_i32 = arith.constant 0 : i32
    %c0_i32_0 = arith.constant 0 : i32
    return %c0_i32, %arg0 : i32, i32
  }
}

</mosaic_0001>

<bundles_post_ra>
// kernel: tpu_custom_call.1
= control target key start
LH: loop header
LB: loop body
LE: loop exit
PB: predicated region body
PF: predicated region fallthrough
CT: control target
= control target key end

     0   :  { %9 = vsyncpa [#allocation5], 0  ;;  %s963_s0 = inlined_call_operand.vmem [shape: f32[3], index: 0, kind: input, shape index: {}]   ;;  %s964_s1 = inlined_call_operand.hbm [shape: f32[24,128], index: 1, kind: input, shape index: {}]   ;;  %s965_s2 = inlined_call_operand.vmem [shape: f32[8,24,24], index: 2, kind: input, shape index: {}]   ;;  %s966_s3 = inlined_call_operand.vmem [shape: f32[8,24,1], index: 3, kind: input, shape index: {}]   ;;  %s967_s4 = inlined_call_operand.hbm [shape: f32[3,128], index: 4, kind: output, shape index: {}]  }
   0x1   :  { %10 = vsyncpa [#allocation3], 0 }
   0x2   :  { %11 = vsyncpa [#allocation4], 0  ;;  %s17_s17 = sshll.u32 %s963_s0, 4  ;;  %s25_s20 = sshll.u32 %s964_s1, 4  ;;  %s18_s17 = int_to_ptr.vmem [resolvable:$true] %s17_s17  ;;  %s26_s20 = int_to_ptr.hbm [resolvable:$true] %s25_s20 }
   0x3   :  { %s749_s21 = smov [#allocation2]   ;;  %s750_s22 = smov [#allocation6]  }
   0x4   :  { %20 = dma.vmem_to_smem %s18_s17, 16, %s749_s21, [#allocation5]  }
   0x5   :  { %s27_s23 = sshll.u32 %s750_s22, 4  ;;  %s751_s24 = smov 128   ;;  %s28_s23 = int_to_ptr.vmem [resolvable:$true] %s27_s23 }
   0x6   :  { %s752_s25 = smov 8  }
   0x7   :  { %33 = dma.hbm_to_vmem [thread:$0]  %s26_s20, 384, %s28_s23, [#allocation3], %s751_s24, %s751_s24, %s752_s25  }
   0x8   :  { %743 = dma.done.wait [#allocation5], 16  }
   0x9   :  { %744 = vsyncadd [#allocation5], 4294967280 }
   0xa   :  { %745 = dma.done.wait [#allocation3], 384  }
   0xb   :  { %746 = vsyncadd [#allocation3], 4294966912 }
   0xc   :  { %46 = sfence }
   0xd   :  { %v52_v0 = vld [vmem:[#allocation6 + $0x10] sm:$0xff]  ;;  %v53_v2 = vld [vmem:[%s966_s3] sm:$0xff]  ;;  %v753_v3 = vmov 0   ;;  %v51_v4 = vld [vmem:[#allocation6 + $0x8] sm:$0xff]  ;;  %vm71_vm0 = vcmask 195584   ;;  %s241_s29 = sld [smem:[#allocation2]] }
   0xe   :  { %v55_v1 = vld [vmem:[%s966_s3 + $0x10] sm:$0xff]  ;;  %681 = vset.pattern.permute.xlu1 %v753_v3  ;;  %680 = vset.pattern.permute.xlu0 %v753_v3  ;;  %v50_v5 = vld [vmem:[#allocation6] sm:$0xff]  ;;  %v54_v7 = vld [vmem:[%s966_s3 + $0x8] sm:$0xff]  ;;  %s645_s16 = sld [smem:[#allocation2 + $0x1]]  ;;  %s754_s7 = smov [#allocation7]  }
   0xf   :  { %94 = vmatpush.msra.mxu0 %v52_v0  ;;  %68 = vperm.xlu0 %680, %v55_v1   ;;  %v47_v6 = vld [vmem:[%s965_s2] sm:$0xff]  ;;  %v614_v8 = vld [vmem:[%s966_s3 + $0x28] sm:$0xff]  ;;  %v623_v10 = vld [vmem:[%s966_s3 + $0x70] sm:$0xff]  ;;  %s664_s1 = sld [smem:[#allocation2 + $0x2]]  ;;  %s593_s8 = sshll.u32 %s754_s7, 4  ;;  %s594_s8 = int_to_ptr.vmem [resolvable:$true] %s593_s8 }
  0x10   :  { %58 = vperm.xlu1 %681, %v53_v2   ;;  %682 = vset.pattern.permute.xlu2 %v753_v3  ;;  %v48_v9 = vld [vmem:[%s965_s2 + $0x8] sm:$0xff]  ;;  %v49_v12 = vld [vmem:[%s965_s2 + $0x10] sm:$0xff]  ;;  %v632_v13 = vld [vmem:[%s966_s3 + $0x40] sm:$0xff]  ;;  %s595_s11 = sshll.u32 %s967_s4, 4  ;;  %s596_s11 = int_to_ptr.hbm [resolvable:$true] %s595_s11 }
  0x11   :  { %95 = vmatpush.msra.mxu0 %v51_v4  ;;  %v622_v11 = vld [vmem:[%s966_s3 + $0x68] sm:$0xff]  ;;  %v631_v14 = vld [vmem:[%s966_s3 + $0x38] sm:$0xff]  ;;  %v640_v16 = vld [vmem:[%s966_s3 + $0x80] sm:$0xff] }
  0x12   :  { %v641_v15 = vld [vmem:[%s966_s3 + $0x88] sm:$0xff]  ;;  %v651_v17 = vld [vmem:[%s966_s3 + $0x58] sm:$0xff]  ;;  %v650_v18 = vld [vmem:[%s966_s3 + $0x50] sm:$0xff] }
  0x13   :  { %96 = vmatpush.msra.mxu0 %v50_v5  ;;  %v660_v19 = vld [vmem:[%s966_s3 + $0xa0] sm:$0xff]  ;;  %v659_v20 = vld [vmem:[%s966_s3 + $0x98] sm:$0xff]  ;;  %v668_v21 = vld [vmem:[%s966_s3 + $0xa8] sm:$0xff] }
  0x14   :  { %606 = vmatmul.msk.f32.vlgmr.msra.gmra.mxu0 %vm71_vm0, %v47_v6  ;;  %v613_v22 = vld [vmem:[%s966_s3 + $0x20] sm:$0xff]  ;;  %v612_v23 = vld [vmem:[%s966_s3 + $0x18] sm:$0xff]  ;;  %v630_v28 = vld [vmem:[%s966_s3 + $0x30] sm:$0xff] }
  0x15   :  { %122 = vperm.xlu2 %682, %v613_v22   ;;  %v621_v25 = vld [vmem:[%s966_s3 + $0x60] sm:$0xff]  ;;  %v639_v33 = vld [vmem:[%s966_s3 + $0x78] sm:$0xff]  ;;  %v649_v37 = vld [vmem:[%s966_s3 + $0x48] sm:$0xff] }
  0x16   :  { %v609_v36 = vld [vmem:[%s965_s2 + $0x18] sm:$0xff]  ;;  %v610_v38 = vld [vmem:[%s965_s2 + $0x20] sm:$0xff]  ;;  %v658_v39 = vld [vmem:[%s966_s3 + $0x90] sm:$0xff] }
  0x17   :  { %63 = vperm.xlu0 %680, %v54_v7   ;;  %v611_v40 = vld [vmem:[%s965_s2 + $0x28] sm:$0xff]  ;;  %v618_v55 = vld [vmem:[%s965_s2 + $0x60] sm:$0xff]  ;;  %v620_v58 = vld [vmem:[%s965_s2 + $0x70] sm:$0xff] }
  0x18   :  { %127 = vperm.xlu1 %681, %v614_v8   ;;  %v619_v57 = vld [vmem:[%s965_s2 + $0x68] sm:$0xff] }
  0x1c   :  { %607 = vmatmul.msk.f32.gmra.mxu0 %vm71_vm0, %v48_v9  ;;  %v242_v9 = vstv %s241_s29 }
  0x1d   :  { %117 = vperm.xlu2 %682, %v612_v23  }
  0x1f   :  { %194 = vperm.xlu0 %680, %v623_v10  }
  0x20   :  { %189 = vperm.xlu1 %681, %v622_v11  }
  0x24   :  { %608 = vmatmul.msk.f32.gmra.mxu0 %vm71_vm0, %v49_v12 }
  0x25   :  { %184 = vperm.xlu2 %682, %v621_v25  }
  0x27   :  { %269 = vperm.xlu0 %680, %v632_v13  }
  0x28   :  { %264 = vperm.xlu1 %681, %v631_v14  }
  0x2d   :  { %259 = vperm.xlu2 %682, %v630_v28  }
  0x2f   :  { %336 = vperm.xlu0 %680, %v641_v15  }
  0x30   :  { %331 = vperm.xlu1 %681, %v640_v16  }
  0x35   :  { %326 = vperm.xlu2 %682, %v639_v33  }
  0x37   :  { %411 = vperm.xlu0 %680, %v651_v17   ;;  %v627_v17 = vld [vmem:[%s965_s2 + $0x30] sm:$0xff] }
  0x38   :  { %406 = vperm.xlu1 %681, %v650_v18   ;;  %v628_v18 = vld [vmem:[%s965_s2 + $0x38] sm:$0xff] }
  0x3d   :  { %401 = vperm.xlu2 %682, %v649_v37   ;;  %v638_v37 = vld [vmem:[%s965_s2 + $0x88] sm:$0xff] }
  0x3f   :  { %478 = vperm.xlu0 %680, %v660_v19   ;;  %v629_v19 = vld [vmem:[%s965_s2 + $0x40] sm:$0xff] }
  0x40   :  { %473 = vperm.xlu1 %681, %v659_v20  }
  0x45   :  { %468 = vperm.xlu2 %682, %v658_v39  }
  0x47   :  { %543 = vperm.xlu0 %680, %v668_v21  }
  0x6f   :  { %v123_v42 = vpop.permute.xlu2 %122 }
  0x77   :  { %v118_v46 = vpop.permute.xlu2 %117 }
  0x7f   :  { %v185_v63 = vpop.permute.xlu2 %184 }
  0x81   :  { %v69_v26 = vpop.permute.xlu0 %68 }
  0x82   :  { %v59_v34 = vpop.permute.xlu1 %58 }
  0x87   :  { %v260_v25 = vpop.permute.xlu2 %259 }
  0x89   :  { %v64_v31 = vpop.permute.xlu0 %63 }
  0x8a   :  { %v128_v44 = vpop.permute.xlu1 %127 }
  0x91   :  { %v98_v24 = vpop.f32.mrf.mxu0  ;;  %v195_v2 = vpop.permute.xlu0 %194 }
  0x92   :  { %v863_v35 = vadd.f32 %v98_v24, %v59_v34  ;;  %v190_v61 = vpop.permute.xlu1 %189  ;;  %v636_v34 = vld [vmem:[%s965_s2 + $0x78] sm:$0xff] }
  0x99   :  { %v101_v27 = vpop.f32.mrf.mxu0  ;;  %v270_v23 = vpop.permute.xlu0 %269 }
  0x9a   :  { %v857_v32 = vadd.f32 %v101_v27, %v64_v31  ;;  %v265_v22 = vpop.permute.xlu1 %264 }
  0xa1   :  { %v104_v29 = vpop.f32.mrf.mxu0 }
  0xa2   :  { %v855_v30 = vadd.f32 %v104_v29, %v69_v26 }
  0xa4   :  { %152 = vmatpush.msra.mxu1 %v855_v30 }
  0xa6   :  { %153 = vmatpush.msra.mxu1 %v857_v32 }
  0xa8   :  { %154 = vmatpush.msra.mxu1 %v863_v35 }
  0xa9   :  { %615 = vmatmul.msk.f32.vlgmr.msra.gmra.mxu1 %vm71_vm0, %v609_v36  ;;  %v637_v36 = vld [vmem:[%s965_s2 + $0x80] sm:$0xff] }
  0xb1   :  { %616 = vmatmul.msk.f32.gmra.mxu1 %vm71_vm0, %v610_v38 }
  0xb9   :  { %617 = vmatmul.msk.f32.gmra.mxu1 %vm71_vm0, %v611_v40  ;;  %v332_v40 = vpop.permute.xlu1 %331 }
 0x126   :  { %v156_v41 = vpop.f32.mrf.mxu1 }
 0x127   :  { %v157_v48 = vadd.f32 %v156_v41, %v118_v46 }
 0x129   :  { %v168_v53 = vmul.f32 0.01, %v157_v48  ;;  %vm165_vm3 = vcmp.ge.f32.partialorder %v157_v48, 0.0 }
 0x12b   :  { %v171_v56 = vsel %vm165_vm3, %v157_v48, %v168_v53 }
 0x12e   :  { %v159_v43 = vpop.f32.mrf.mxu1 }
 0x12f   :  { %v160_v45 = vadd.f32 %v159_v43, %v123_v42  ;;  %v327_v42 = vpop.permute.xlu2 %326 }
 0x131   :  { %v169_v51 = vmul.f32 0.01, %v160_v45  ;;  %vm166_vm2 = vcmp.ge.f32.partialorder %v160_v45, 0.0 }
 0x133   :  { %v172_v54 = vsel %vm166_vm2, %v160_v45, %v169_v51  ;;  %v337_v45 = vpop.permute.xlu0 %336 }
 0x136   :  { %v162_v47 = vpop.f32.mrf.mxu1 }
 0x137   :  { %v163_v49 = vadd.f32 %v162_v47, %v128_v44 }
 0x139   :  { %vm167_vm1 = vcmp.ge.f32.partialorder %v163_v49, 0.0  ;;  %v170_v50 = vmul.f32 0.01, %v163_v49 }
 0x13b   :  { %v173_v52 = vsel %vm167_vm1, %v163_v49, %v170_v50 }
 0x13c   :  { %219 = vmatpush.msra.mxu2 %v173_v52  ;;  %v384_v52 = vstv %s645_s16 }
 0x13e   :  { %220 = vmatpush.msra.mxu2 %v172_v54 }
 0x140   :  { %221 = vmatpush.msra.mxu2 %v171_v56 }
 0x141   :  { %624 = vmatmul.msk.f32.vlgmr.msra.gmra.mxu2 %vm71_vm0, %v618_v55 }
 0x149   :  { %625 = vmatmul.msk.f32.gmra.mxu2 %vm71_vm0, %v619_v57 }
 0x151   :  { %626 = vmatmul.msk.f32.gmra.mxu2 %vm71_vm0, %v620_v58 }
 0x1c4   :  { %v223_v59 = vpop.f32.mrf.mxu2 }
 0x1c5   :  { %v224_v0 = vadd.f32 %v223_v59, %v185_v63 }
 0x1c7   :  { %v235_v4 = vmul.f32 0.01, %v224_v0  ;;  %vm232_vm5 = vcmp.ge.f32.partialorder %v224_v0, 0.0 }
 0x1c9   :  { %v238_v10 = vsel %vm232_vm5, %v224_v0, %v235_v4  ;;  %v402_v4 = vpop.permute.xlu2 %401 }
 0x1ca   :  { %v243_v14 = vmul.f32 %v242_v9, %v238_v10 }
 0x1cc   :  { %v226_v60 = vpop.f32.mrf.mxu2  ;;  %v246_v16 = vadd.f32 %v243_v14, %v863_v35 }
 0x1cd   :  { %v227_v62 = vadd.f32 %v226_v60, %v190_v61  ;;  %v646_v60 = vld [vmem:[%s965_s2 + $0x48] sm:$0xff]  ;;  %v647_v61 = vld [vmem:[%s965_s2 + $0x50] sm:$0xff] }
 0x1cf   :  { %v236_v1 = vmul.f32 0.01, %v227_v62  ;;  %vm233_vm4 = vcmp.ge.f32.partialorder %v227_v62, 0.0 }
 0x1d1   :  { %v239_v7 = vsel %vm233_vm4, %v227_v62, %v236_v1  ;;  %v648_v62 = vld [vmem:[%s965_s2 + $0x58] sm:$0xff]  ;;  %v407_v1 = vpop.permute.xlu1 %406 }
 0x1d2   :  { %v244_v12 = vmul.f32 %v242_v9, %v239_v7 }
 0x1d4   :  { %v229_v3 = vpop.f32.mrf.mxu2  ;;  %v247_v15 = vadd.f32 %v244_v12, %v857_v32 }
 0x1d5   :  { %v230_v5 = vadd.f32 %v229_v3, %v195_v2  ;;  %v412_v2 = vpop.permute.xlu0 %411 }
 0x1d7   :  { %vm234_vm6 = vcmp.ge.f32.partialorder %v230_v5, 0.0  ;;  %v237_v6 = vmul.f32 0.01, %v230_v5 }
 0x1d9   :  { %v240_v8 = vsel %vm234_vm6, %v230_v5, %v237_v6 }
 0x1da   :  { %v245_v11 = vmul.f32 %v242_v9, %v240_v8 }
 0x1dc   :  { %v248_v13 = vadd.f32 %v245_v11, %v855_v30 }
 0x1de   :  { %294 = vmatpush.msra.mxu3 %v248_v13 }
 0x1e0   :  { %295 = vmatpush.msra.mxu3 %v247_v15 }
 0x1e2   :  { %296 = vmatpush.msra.mxu3 %v246_v16 }
 0x1e3   :  { %633 = vmatmul.msk.f32.vlgmr.msra.gmra.mxu3 %vm71_vm0, %v627_v17 }
 0x1eb   :  { %634 = vmatmul.msk.f32.gmra.mxu3 %vm71_vm0, %v628_v18 }
 0x1f3   :  { %635 = vmatmul.msk.f32.gmra.mxu3 %vm71_vm0, %v629_v19  ;;  %v474_v19 = vpop.permute.xlu1 %473 }
 0x266   :  { %v298_v20 = vpop.f32.mrf.mxu3 }
 0x267   :  { %v299_v27 = vadd.f32 %v298_v20, %v260_v25 }
 0x269   :  { %v310_v32 = vmul.f32 0.01, %v299_v27  ;;  %vm307_vm9 = vcmp.ge.f32.partialorder %v299_v27, 0.0 }
 0x26b   :  { %v313_v35 = vsel %vm307_vm9, %v299_v27, %v310_v32 }
 0x26e   :  { %v301_v21 = vpop.f32.mrf.mxu3 }
 0x26f   :  { %v302_v24 = vadd.f32 %v301_v21, %v265_v22  ;;  %v469_v21 = vpop.permute.xlu2 %468 }
 0x271   :  { %v311_v30 = vmul.f32 0.01, %v302_v24  ;;  %vm308_vm8 = vcmp.ge.f32.partialorder %v302_v24, 0.0 }
 0x273   :  { %v314_v33 = vsel %vm308_vm8, %v302_v24, %v311_v30  ;;  %v479_v24 = vpop.permute.xlu0 %478 }
 0x276   :  { %v304_v26 = vpop.f32.mrf.mxu3 }
 0x277   :  { %v305_v28 = vadd.f32 %v304_v26, %v270_v23 }
 0x279   :  { %vm309_vm7 = vcmp.ge.f32.partialorder %v305_v28, 0.0  ;;  %v312_v29 = vmul.f32 0.01, %v305_v28 }
 0x27b   :  { %v315_v31 = vsel %vm309_vm7, %v305_v28, %v312_v29 }
 0x27c   :  { %361 = vmatpush.msrb.mxu0 %v315_v31  ;;  %v526_v31 = vstv %s664_s1 }
 0x27e   :  { %362 = vmatpush.msrb.mxu0 %v314_v33 }
 0x280   :  { %363 = vmatpush.msrb.mxu0 %v313_v35 }
 0x281   :  { %642 = vmatmul.msk.f32.vlgmr.msrb.gmra.mxu0 %vm71_vm0, %v636_v34 }
 0x289   :  { %643 = vmatmul.msk.f32.gmra.mxu0 %vm71_vm0, %v637_v36 }
 0x291   :  { %644 = vmatmul.msk.f32.gmra.mxu0 %vm71_vm0, %v638_v37 }
 0x2fe   :  { %v365_v38 = vpop.f32.mrf.mxu0 }
 0x2ff   :  { %v366_v43 = vadd.f32 %v365_v38, %v327_v42  ;;  %v544_v42 = vpop.permute.xlu0 %543 }
 0x301   :  { %v377_v47 = vmul.f32 0.01, %v366_v43  ;;  %vm374_vm11 = vcmp.ge.f32.partialorder %v366_v43, 0.0 }
 0x303   :  { %v380_v53 = vsel %vm374_vm11, %v366_v43, %v377_v47 }
 0x304   :  { %v385_v57 = vmul.f32 %v384_v52, %v380_v53 }
 0x306   :  { %v368_v39 = vpop.f32.mrf.mxu0  ;;  %v388_v59 = vadd.f32 %v385_v57, %v246_v16  ;;  %v657_v16 = vld [vmem:[%s965_s2 + $0xa0] sm:$0xff] }
 0x307   :  { %v369_v41 = vadd.f32 %v368_v39, %v332_v40  ;;  %v665_v39 = vld [vmem:[%s965_s2 + $0xa8] sm:$0xff]  ;;  %v666_v40 = vld [vmem:[%s965_s2 + $0xb0] sm:$0xff] }
 0x309   :  { %v378_v44 = vmul.f32 0.01, %v369_v41  ;;  %vm375_vm10 = vcmp.ge.f32.partialorder %v369_v41, 0.0 }
 0x30b   :  { %v381_v50 = vsel %vm375_vm10, %v369_v41, %v378_v44  ;;  %v667_v41 = vld [vmem:[%s965_s2 + $0xb8] sm:$0xff] }
 0x30c   :  { %v386_v55 = vmul.f32 %v384_v52, %v381_v50 }
 0x30e   :  { %v371_v46 = vpop.f32.mrf.mxu0  ;;  %v389_v58 = vadd.f32 %v386_v55, %v247_v15  ;;  %v656_v15 = vld [vmem:[%s965_s2 + $0x98] sm:$0xff] }
 0x30f   :  { %v372_v48 = vadd.f32 %v371_v46, %v337_v45 }
 0x311   :  { %vm376_vm12 = vcmp.ge.f32.partialorder %v372_v48, 0.0  ;;  %v379_v49 = vmul.f32 0.01, %v372_v48 }
 0x313   :  { %v382_v51 = vsel %vm376_vm12, %v372_v48, %v379_v49 }
 0x314   :  { %v387_v54 = vmul.f32 %v384_v52, %v382_v51 }
 0x316   :  { %v390_v56 = vadd.f32 %v387_v54, %v248_v13  ;;  %v655_v13 = vld [vmem:[%s965_s2 + $0x90] sm:$0xff] }
 0x318   :  { %436 = vmatpush.msrb.mxu1 %v390_v56 }
 0x31a   :  { %437 = vmatpush.msrb.mxu1 %v389_v58 }
 0x31c   :  { %438 = vmatpush.msrb.mxu1 %v388_v59 }
 0x31d   :  { %652 = vmatmul.msk.f32.vlgmr.msrb.gmra.mxu1 %vm71_vm0, %v646_v60 }
 0x325   :  { %653 = vmatmul.msk.f32.gmra.mxu1 %vm71_vm0, %v647_v61 }
 0x32d   :  { %654 = vmatmul.msk.f32.gmra.mxu1 %vm71_vm0, %v648_v62 }
 0x39a   :  { %v440_v63 = vpop.f32.mrf.mxu1 }
 0x39b   :  { %v441_v6 = vadd.f32 %v440_v63, %v402_v4 }
 0x39d   :  { %v452_v11 = vmul.f32 0.01, %v441_v6  ;;  %vm449_vm15 = vcmp.ge.f32.partialorder %v441_v6, 0.0 }
 0x39f   :  { %v455_v14 = vsel %vm449_vm15, %v441_v6, %v452_v11 }
 0x3a2   :  { %v443_v0 = vpop.f32.mrf.mxu1 }
 0x3a3   :  { %v444_v3 = vadd.f32 %v443_v0, %v407_v1 }
 0x3a5   :  { %v453_v9 = vmul.f32 0.01, %v444_v3  ;;  %vm450_vm14 = vcmp.ge.f32.partialorder %v444_v3, 0.0 }
 0x3a7   :  { %v456_v12 = vsel %vm450_vm14, %v444_v3, %v453_v9 }
 0x3aa   :  { %v446_v5 = vpop.f32.mrf.mxu1 }
 0x3ab   :  { %v447_v7 = vadd.f32 %v446_v5, %v412_v2 }
 0x3ad   :  { %vm451_vm13 = vcmp.ge.f32.partialorder %v447_v7, 0.0  ;;  %v454_v8 = vmul.f32 0.01, %v447_v7 }
 0x3af   :  { %v457_v10 = vsel %vm451_vm13, %v447_v7, %v454_v8 }
 0x3b0   :  { %503 = vmatpush.msrb.mxu2 %v457_v10 }
 0x3b2   :  { %504 = vmatpush.msrb.mxu2 %v456_v12 }
 0x3b4   :  { %505 = vmatpush.msrb.mxu2 %v455_v14 }
 0x3b5   :  { %661 = vmatmul.msk.f32.vlgmr.msrb.gmra.mxu2 %vm71_vm0, %v655_v13 }
 0x3bd   :  { %662 = vmatmul.msk.f32.gmra.mxu2 %vm71_vm0, %v656_v15 }
 0x3c5   :  { %663 = vmatmul.msk.f32.gmra.mxu2 %vm71_vm0, %v657_v16 }
 0x438   :  { %v507_v17 = vpop.f32.mrf.mxu2 }
 0x439   :  { %v508_v22 = vadd.f32 %v507_v17, %v469_v21 }
 0x43b   :  { %v519_v26 = vmul.f32 0.01, %v508_v22  ;;  %vm516_vm2 = vcmp.ge.f32.partialorder %v508_v22, 0.0 }
 0x43d   :  { %v522_v32 = vsel %vm516_vm2, %v508_v22, %v519_v26 }
 0x43e   :  { %v527_v36 = vmul.f32 %v526_v31, %v522_v32 }
 0x440   :  { %v510_v18 = vpop.f32.mrf.mxu2  ;;  %v530_v38 = vadd.f32 %v527_v36, %v388_v59 }
 0x441   :  { %v511_v20 = vadd.f32 %v510_v18, %v474_v19 }
 0x443   :  { %v520_v23 = vmul.f32 0.01, %v511_v20  ;;  %vm517_vm1 = vcmp.ge.f32.partialorder %v511_v20, 0.0 }
 0x445   :  { %v523_v29 = vsel %vm517_vm1, %v511_v20, %v520_v23 }
 0x446   :  { %v528_v34 = vmul.f32 %v526_v31, %v523_v29 }
 0x448   :  { %v513_v25 = vpop.f32.mrf.mxu2  ;;  %v531_v37 = vadd.f32 %v528_v34, %v389_v58 }
 0x449   :  { %v514_v27 = vadd.f32 %v513_v25, %v479_v24 }
 0x44b   :  { %vm518_vm3 = vcmp.ge.f32.partialorder %v514_v27, 0.0  ;;  %v521_v28 = vmul.f32 0.01, %v514_v27 }
 0x44d   :  { %v524_v30 = vsel %vm518_vm3, %v514_v27, %v521_v28 }
 0x44e   :  { %v529_v33 = vmul.f32 %v526_v31, %v524_v30 }
 0x450   :  { %v532_v35 = vadd.f32 %v529_v33, %v390_v56 }
 0x452   :  { %576 = vmatpush.msrb.mxu3 %v532_v35 }
 0x454   :  { %577 = vmatpush.msrb.mxu3 %v531_v37 }
 0x456   :  { %578 = vmatpush.msrb.mxu3 %v530_v38 }
 0x457   :  { %671 = vmatmul.msk.f32.vlgmr.msrb.gmra.mxu3 %vm71_vm0, %v665_v39 }
 0x45f   :  { %672 = vmatmul.msk.f32.gmra.mxu3 %vm71_vm0, %v666_v40 }
 0x467   :  { %673 = vmatmul.msk.f32.gmra.mxu3 %vm71_vm0, %v667_v41 }
 0x4da   :  { %v580_v43 = vpop.f32.mrf.mxu3 }
 0x4db   :  { %v581_v44 = vadd.f32 %v580_v43, %v544_v42 }
 0x4dd   :  { %587 = vst [vmem:[#allocation7] sm:$0x7] %v581_v44 }
 0x4de   :  { %598 = dma.vmem_to_hbm [thread:$0]  %s594_s8, 64, %s596_s11, [#allocation4]  }
 0x4e2   :  { %v583_v45 = vpop.f32.mrf.mxu3 }
 0x4ea   :  { %v585_v46 = vpop.f32.mrf.mxu3 }
 0x4eb   :  { %747 = dma.done.wait [#allocation4], 64  }
 0x4ec   :  { %748 = vsyncadd [#allocation4], 4294967232 }
 0x4ed   :  { %603 = vsyncpa [#allocation3], 1 }
 0x4ee   :  { %604 = vsyncpa [#allocation4], 1 }
 0x4ef   :  { %605 = vsyncpa [#allocation5], 1 }

</bundles_post_ra>
